<compile_context>
chip_gen: v6e
topology: v6e:2x2x1
jax: 0.10.0
libtpu: 0.0.40
codegen_flags: <defaults>
</compile_context>

<pallas_src>
import functools

import jax
import jax.numpy as jnp
from jax.experimental import pallas as pl
from jax.experimental.pallas import tpu as pltpu


def _round_up(n, m):
    return ((n + m - 1) // m) * m


def _coxnnet_kernel(x_ref, w1_ref, b1_ref, w2_ref, o_ref, acc_ref):
    # x_ref : (tile_b, tile_k)   w1_ref: (tile_k, ds_pad)
    # b1_ref: (1, ds_pad)        w2_ref: (ds_pad, 1)
    # o_ref : (tile_b, 1)        acc_ref: (tile_b, ds_pad) f32 scratch
    k = pl.program_id(1)

    @pl.when(k == 0)
    def _():
        acc_ref[...] = jnp.zeros_like(acc_ref)

    # Accumulate the layer1 pre-activation over the K (in_f) grid axis.
    acc_ref[...] += jnp.dot(
        x_ref[...], w1_ref[...], preferred_element_type=jnp.float32
    )

    @pl.when(k == pl.num_programs(1) - 1)
    def _():
        # bias + tanh in f32 (v5e has no bf16 VPU/EUP path).
        h = jnp.tanh(acc_ref[...] + b1_ref[...])
        # dropout1: identity in inference mode.
        # Cox output layer: (tile_b, ds_pad) @ (ds_pad, 1) -> (tile_b, 1).
        out = jnp.dot(h, w2_ref[...], preferred_element_type=jnp.float32)
        o_ref[...] = out.astype(o_ref.dtype)


@functools.partial(jax.jit, static_argnames=("tile_b", "tile_k", "compute_dtype"))
def coxnnet_forward(x, w1, b1, w2, *, tile_b=None, tile_k=None,
                    compute_dtype=None):
    """Fused Coxnnet forward.

    x: (B, in_f), w1: (in_f, ds), b1: (ds,), w2: (ds, 1)  ->  (B, 1)

    compute_dtype: optional (e.g. jnp.bfloat16) to run the layer1 matmul in
    bf16 on v6e/v7x (f32 accumulate retained). Default: keep input dtype.
    """
    B, in_f = x.shape
    ds = w1.shape[1]
    assert w1.shape == (in_f, ds)
    assert b1.shape == (ds,)
    assert w2.shape == (ds, 1)
    out_dtype = x.dtype

    # ---- padded problem sizes (all padding is with zeros -> exact math) ----
    ds_pad = _round_up(ds, 128)          # lane-dense hidden activation
    k_real_pad = _round_up(in_f, 128)    # 128-aligned MXU K feed

    # ---- tile selection ----------------------------------------------------
    if tile_b is None:
        # Large batches: 512-row tiles (multiple of 256 -> full MXU M feed,
        # many grid steps -> pipelining + megacore). Small batches: one tile.
        tile_b = 512 if B >= 512 else _round_up(B, 8)
    tile_b = _round_up(tile_b, 8)
    b_pad = _round_up(B, tile_b)

    if tile_k is None:
        # Cap the resident x / w1 slabs; 2048 keeps the double-buffered
        # working set ~10 MiB at tile_b=512, well inside v7x's VMEM.
        tile_k = min(k_real_pad, 2048)
    tile_k = _round_up(tile_k, 128)
    k_pad = _round_up(k_real_pad, tile_k)

    # ---- pad operands ------------------------------------------------------
    x_p = jnp.pad(x, ((0, b_pad - B), (0, k_pad - in_f)))
    w1_p = jnp.pad(w1, ((0, k_pad - in_f), (0, ds_pad - ds)))
    b1_p = jnp.pad(b1, (0, ds_pad - ds)).reshape(1, ds_pad)
    w2_p = jnp.pad(w2, ((0, ds_pad - ds), (0, 0)))

    if compute_dtype is not None:
        x_p = x_p.astype(compute_dtype)
        w1_p = w1_p.astype(compute_dtype)
    in_bytes = jnp.dtype(x_p.dtype).itemsize

    grid = (b_pad // tile_b, k_pad // tile_k)

    # ---- VMEM budget (double-buffered inputs + scratch), capped for v7x ----
    est_vmem = (
        2 * (tile_b * tile_k + tile_k * ds_pad) * in_bytes   # x, w1 (2 bufs)
        + 2 * tile_b * 1 * 4                                 # out (2 bufs)
        + tile_b * ds_pad * 4                                # accumulator
        + 2 * (ds_pad * 4 + ds_pad * 4)                      # b1, w2
    )
    vmem_limit = min(max(2 * est_vmem, 16 * 1024 * 1024), 48 * 1024 * 1024)

    cost = pl.CostEstimate(
        flops=2 * B * in_f * ds + 2 * B * ds,
        transcendentals=B * ds,
        bytes_accessed=(x_p.size * in_bytes + w1_p.size * in_bytes
                        + b1_p.size * 4 + w2_p.size * 4 + b_pad * 4),
    )

    out_padded = pl.pallas_call(
        _coxnnet_kernel,
        out_shape=jax.ShapeDtypeStruct((b_pad, 1), out_dtype),
        grid_spec=pltpu.PrefetchScalarGridSpec(
            num_scalar_prefetch=0,
            grid=grid,
            in_specs=[
                pl.BlockSpec((tile_b, tile_k), lambda i, k: (i, k)),   # x
                pl.BlockSpec((tile_k, ds_pad), lambda i, k: (k, 0)),   # w1
                pl.BlockSpec((1, ds_pad), lambda i, k: (0, 0)),        # b1
                pl.BlockSpec((ds_pad, 1), lambda i, k: (0, 0)),        # w2
            ],
            out_specs=pl.BlockSpec((tile_b, 1), lambda i, k: (i, 0)),
            scratch_shapes=[pltpu.VMEM((tile_b, ds_pad), jnp.float32)],
        ),
        compiler_params=pltpu.CompilerParams(
            dimension_semantics=("parallel", "arbitrary"),
            vmem_limit_bytes=int(vmem_limit),
        ),
        cost_estimate=cost,
    )(x_p, w1_p, b1_p, w2_p)

    return out_padded[:B]


def _reference(x, w1, b1, w2):
    h = jnp.tanh(x @ w1 + b1)
    return h @ w2


if __name__ == "__main__":
    key = jax.random.PRNGKey(0)

    # ---- test 1: small shapes consistent with the module --------------------
    B, in_f, ds = 8, 64, 32
    kx, kw1, kb1, kw2 = jax.random.split(key, 4)
    x = jax.random.normal(kx, (B, in_f), dtype=jnp.float32)
    w1 = jax.random.normal(kw1, (in_f, ds), dtype=jnp.float32) * 0.1
    b1 = jax.random.normal(kb1, (ds,), dtype=jnp.float32) * 0.1
    w2 = jax.random.normal(kw2, (ds, 1), dtype=jnp.float32) * 0.1

    out = jax.block_until_ready(coxnnet_forward(x, w1, b1, w2))
    ref = _reference(x, w1, b1, w2)
    assert out.shape == (B, 1)
    assert jnp.allclose(out, ref, atol=1e-4, rtol=1e-4)

    # ---- test 2: exercise the K-tiled accumulator / multi-step grid path ----
    B2, in_f2, ds2 = 16, 256, 32
    kx2, kw12, kb12, kw22 = jax.random.split(jax.random.PRNGKey(1), 4)
    x2 = jax.random.normal(kx2, (B2, in_f2), dtype=jnp.float32)
    w12 = jax.random.normal(kw12, (in_f2, ds2), dtype=jnp.float32) * 0.05
    b12 = jax.random.normal(kb12, (ds2,), dtype=jnp.float32) * 0.05
    w22 = jax.random.normal(kw22, (ds2, 1), dtype=jnp.float32) * 0.05

    out2 = jax.block_until_ready(
        coxnnet_forward(x2, w12, b12, w22, tile_b=8, tile_k=128)
    )
    ref2 = _reference(x2, w12, b12, w22)
    assert out2.shape == (B2, 1)
    assert jnp.allclose(out2, ref2, atol=1e-4, rtol=1e-4)

    print("KERNEL_OK")
</pallas_src>

<mosaic_0001>
module attributes {stable_mosaic.version = 11 : i64} {
  func.func @_coxnnet_kernel(%arg0: i32, %arg1: i32, %arg2: memref<8x128xf32, #tpu.memory_space<vmem>>, %arg3: memref<128x128xf32, #tpu.memory_space<vmem>>, %arg4: memref<1x128xf32, #tpu.memory_space<vmem>>, %arg5: memref<128x1xf32, #tpu.memory_space<vmem>>, %arg6: memref<8x1xf32, #tpu.memory_space<vmem>>, %arg7: memref<8x128xf32, #tpu.memory_space<vmem>>) attributes {dimension_semantics = [#tpu.dimension_semantics<parallel>, #tpu.dimension_semantics<arbitrary>], iteration_bounds = array<i64: 1, 1>, scalar_prefetch = 0 : i64, scratch_operands = 1 : i64, tpu.core_type = #tpu.core_type<tc>, window_params = [{transform_indices = @transform_0, window_bounds = array<i64: 8, 128>}, {transform_indices = @transform_1, window_bounds = array<i64: 128, 128>}, {pipeline_mode = #tpu.pipeline_mode<synchronous>, transform_indices = @transform_2, window_bounds = array<i64: 1, 128>}, {pipeline_mode = #tpu.pipeline_mode<synchronous>, transform_indices = @transform_3, window_bounds = array<i64: 128, 1>}, {transform_indices = @transform_4, window_bounds = array<i64: 8, 1>}]} {
    %c0_i32 = arith.constant 0 : i32
    %0 = arith.cmpi eq, %arg1, %c0_i32 : i32
    %1 = arith.extui %0 : i1 to i32
    %c0_i32_0 = arith.constant 0 : i32
    %2 = arith.cmpi ne, %1, %c0_i32_0 : i32
    scf.if %2 {
      %cst_10 = arith.constant 0.000000e+00 : f32
      %12 = vector.broadcast %cst_10 : f32 to vector<8x128xf32>
      %c0_11 = arith.constant 0 : index
      %c0_12 = arith.constant 0 : index
      %13 = vector.load %arg7[%c0_11, %c0_12] : memref<8x128xf32, #tpu.memory_space<vmem>>, vector<8x128xf32>
      tpu.vector_store %arg7[%c0_11, %c0_12], %12 {strides = array<i32>} : memref<8x128xf32, #tpu.memory_space<vmem>>, vector<8x128xf32>,
    } else {
    }
    %c0 = arith.constant 0 : index
    %c0_1 = arith.constant 0 : index
    %3 = vector.load %arg7[%c0, %c0_1] : memref<8x128xf32, #tpu.memory_space<vmem>>, vector<8x128xf32>
    %c0_2 = arith.constant 0 : index
    %c0_3 = arith.constant 0 : index
    %4 = vector.load %arg2[%c0_2, %c0_3] : memref<8x128xf32, #tpu.memory_space<vmem>>, vector<8x128xf32>
    %c0_4 = arith.constant 0 : index
    %c0_5 = arith.constant 0 : index
    %5 = vector.load %arg3[%c0_4, %c0_5] : memref<128x128xf32, #tpu.memory_space<vmem>>, vector<128x128xf32>
    %cst = arith.constant dense<0.000000e+00> : vector<8x128xf32>
    %6 = tpu.matmul %4, %5, %cst {dimension_numbers = #tpu.dot_dimension_numbers<[1], [0], [0], [1], [0, 0, 1, 1], [], []>} : vector<8x128xf32>, vector<128x128xf32>, vector<8x128xf32> -> vector<8x128xf32>
    %7 = arith.addf %3, %6 : vector<8x128xf32>
    %c0_6 = arith.constant 0 : index
    %c0_7 = arith.constant 0 : index
    %8 = vector.load %arg7[%c0_6, %c0_7] : memref<8x128xf32, #tpu.memory_space<vmem>>, vector<8x128xf32>
    tpu.vector_store %arg7[%c0_6, %c0_7], %7 {strides = array<i32>} : memref<8x128xf32, #tpu.memory_space<vmem>>, vector<8x128xf32>,
    %c0_i32_8 = arith.constant 0 : i32
    %9 = arith.cmpi eq, %arg1, %c0_i32_8 : i32
    %10 = arith.extui %9 : i1 to i32
    %c0_i32_9 = arith.constant 0 : i32
    %11 = arith.cmpi ne, %10, %c0_i32_9 : i32
    scf.if %11 {
      %c0_10 = arith.constant 0 : index
      %c0_11 = arith.constant 0 : index
      %12 = vector.load %arg7[%c0_10, %c0_11] : memref<8x128xf32, #tpu.memory_space<vmem>>, vector<8x128xf32>
      %c0_12 = arith.constant 0 : index
      %c0_13 = arith.constant 0 : index
      %13 = vector.load %arg4[%c0_12, %c0_13] : memref<1x128xf32, #tpu.memory_space<vmem>>, vector<1x128xf32>
      %14 = vector.broadcast %13 : vector<1x128xf32> to vector<8x128xf32>
      %15 = arith.addf %12, %14 : vector<8x128xf32>
      %16 = math.tanh %15 : vector<8x128xf32>
      %c0_14 = arith.constant 0 : index
      %c0_15 = arith.constant 0 : index
      %17 = vector.load %arg5[%c0_14, %c0_15] : memref<128x1xf32, #tpu.memory_space<vmem>>, vector<128x1xf32>
      %cst_16 = arith.constant dense<0.000000e+00> : vector<8x1xf32>
      %18 = tpu.matmul %16, %17, %cst_16 {dimension_numbers = #tpu.dot_dimension_numbers<[1], [0], [0], [1], [0, 0, 1, 1], [], []>} : vector<8x128xf32>, vector<128x1xf32>, vector<8x1xf32> -> vector<8x1xf32>
      %c0_17 = arith.constant 0 : index
      %c0_18 = arith.constant 0 : index
      %19 = vector.load %arg6[%c0_17, %c0_18] : memref<8x1xf32, #tpu.memory_space<vmem>>, vector<8x1xf32>
      tpu.vector_store %arg6[%c0_17, %c0_18], %18 {strides = array<i32>} : memref<8x1xf32, #tpu.memory_space<vmem>>, vector<8x1xf32>,
    } else {
    }
    return
  }
  func.func @transform_0(%arg0: i32, %arg1: i32) -> (i32, i32) {
    %c0_i32 = arith.constant 0 : i32
    return %arg0, %arg1 : i32, i32
  }
  func.func @transform_1(%arg0: i32, %arg1: i32) -> (i32, i32) {
    %c0_i32 = arith.constant 0 : i32
    %c0_i32_0 = arith.constant 0 : i32
    return %arg1, %c0_i32 : i32, i32
  }
  func.func @transform_2(%arg0: i32, %arg1: i32) -> (i32, i32) {
    %c0_i32 = arith.constant 0 : i32
    %c0_i32_0 = arith.constant 0 : i32
    %c0_i32_1 = arith.constant 0 : i32
    return %c0_i32, %c0_i32_0 : i32, i32
  }
  func.func @transform_3(%arg0: i32, %arg1: i32) -> (i32, i32) {
    %c0_i32 = arith.constant 0 : i32
    %c0_i32_0 = arith.constant 0 : i32
    %c0_i32_1 = arith.constant 0 : i32
    return %c0_i32, %c0_i32_0 : i32, i32
  }
  func.func @transform_4(%arg0: i32, %arg1: i32) -> (i32, i32) {
    %c0_i32 = arith.constant 0 : i32
    %c0_i32_0 = arith.constant 0 : i32
    return %arg0, %c0_i32 : i32, i32
  }
}

</mosaic_0001>

<bundles_post_ra>
// kernel: coxnnet_forward.1
= control target key start
LH: loop header
LB: loop body
LE: loop exit
PB: predicated region body
PF: predicated region fallthrough
CT: control target
= control target key end

     0   :  { %v326_v0 = vmov 0.0   ;;  %vm327_vm0 = vmmov 0   ;;  %vm211_vm1 = vcmask 7168   ;;  %s492_s1 = inlined_call_operand.vmem [shape: f32[128,128], index: 1, kind: input, shape index: {}]   ;;  %s493_s3 = inlined_call_operand.vmem [shape: f32[128,1], index: 3, kind: input, shape index: {}]   ;;  %s494_s0 = inlined_call_operand.vmem [shape: f32[8,128], index: 0, kind: input, shape index: {}]   ;;  %s495_s2 = inlined_call_operand.vmem [shape: f32[1,128], index: 2, kind: input, shape index: {}]   ;;  %s496_s4 = inlined_call_operand.vmem [shape: f32[8,1], index: 4, kind: output, shape index: {}]  }
   0x1   :  { %252 = vmatprep.subr.mxu0 %v326_v0  ;;  %v39_v1 = vld [vmem:[%s492_s1 + $0x78] sm:$0xff]  ;;  %v38_v2 = vld [vmem:[%s492_s1 + $0x70] sm:$0xff]  ;;  %284 = vmatprep.mubr.msk.f32.mxu0 %vm327_vm0, %v326_v0  ;;  %v37_v3 = vld [vmem:[%s492_s1 + $0x68] sm:$0xff] }
   0x2   :  { %253 = vmatpush3.msra.mxu0 %v39_v1  ;;  %287 = vmatprep.subr.mxu1 %v326_v0  ;;  %v36_v4 = vld [vmem:[%s492_s1 + $0x60] sm:$0xff]  ;;  %v140_v5 = vld [vmem:[%s493_s3 + $0x78] sm:$0xff]  ;;  %v139_v7 = vld [vmem:[%s493_s3 + $0x70] sm:$0xff] }
   0x3   :  { %254 = vmatprep.subr.mxu0 %v326_v0  ;;  %319 = vmatprep.mubr.msk.f32.mxu1 %vm327_vm0, %v326_v0  ;;  %v35_v6 = vld [vmem:[%s492_s1 + $0x58] sm:$0xff]  ;;  %v138_v8 = vld [vmem:[%s493_s3 + $0x68] sm:$0xff]  ;;  %v34_v9 = vld [vmem:[%s492_s1 + $0x50] sm:$0xff] }
   0x4   :  { %255 = vmatpush3.msra.mxu0 %v38_v2  ;;  %288 = vmatpush3.msra.mxu1 %v140_v5  ;;  %v137_v10 = vld [vmem:[%s493_s3 + $0x60] sm:$0xff]  ;;  %v33_v11 = vld [vmem:[%s492_s1 + $0x48] sm:$0xff]  ;;  %v136_v12 = vld [vmem:[%s493_s3 + $0x58] sm:$0xff] }
   0x5   :  { %256 = vmatprep.subr.mxu0 %v326_v0  ;;  %289 = vmatprep.subr.mxu1 %v326_v0  ;;  %v32_v13 = vld [vmem:[%s492_s1 + $0x40] sm:$0xff]  ;;  %v135_v14 = vld [vmem:[%s493_s3 + $0x50] sm:$0xff]  ;;  %v31_v15 = vld [vmem:[%s492_s1 + $0x38] sm:$0xff] }
   0x6   :  { %257 = vmatpush3.msra.mxu0 %v37_v3  ;;  %290 = vmatpush3.msra.mxu1 %v139_v7  ;;  %v134_v16 = vld [vmem:[%s493_s3 + $0x48] sm:$0xff]  ;;  %v30_v17 = vld [vmem:[%s492_s1 + $0x30] sm:$0xff]  ;;  %v28_v19 = vld [vmem:[%s492_s1 + $0x20] sm:$0xff] }
   0x7   :  { %258 = vmatprep.subr.mxu0 %v326_v0  ;;  %291 = vmatprep.subr.mxu1 %v326_v0  ;;  %v29_v18 = vld [vmem:[%s492_s1 + $0x28] sm:$0xff]  ;;  %v27_v20 = vld [vmem:[%s492_s1 + $0x18] sm:$0xff]  ;;  %v26_v21 = vld [vmem:[%s492_s1 + $0x10] sm:$0xff] }
   0x8   :  { %259 = vmatpush3.msra.mxu0 %v36_v4  ;;  %292 = vmatpush3.msra.mxu1 %v138_v8  ;;  %v25_v22 = vld [vmem:[%s492_s1 + $0x8] sm:$0xff]  ;;  %v24_v23 = vld [vmem:[%s492_s1] sm:$0xff]  ;;  %v132_v26 = vld [vmem:[%s493_s3 + $0x38] sm:$0xff] }
   0x9   :  { %260 = vmatprep.subr.mxu0 %v326_v0  ;;  %293 = vmatprep.subr.mxu1 %v326_v0  ;;  %v23_v24 = vld [vmem:[%s494_s0] sm:$0xff]  ;;  %v131_v27 = vld [vmem:[%s493_s3 + $0x30] sm:$0xff]  ;;  %v130_v28 = vld [vmem:[%s493_s3 + $0x28] sm:$0xff] }
   0xa   :  { %261 = vmatpush3.msra.mxu0 %v35_v6  ;;  %294 = vmatpush3.msra.mxu1 %v137_v10  ;;  %v133_v25 = vld [vmem:[%s493_s3 + $0x40] sm:$0xff]  ;;  %v128_v30 = vld [vmem:[%s493_s3 + $0x18] sm:$0xff]  ;;  %v127_v31 = vld [vmem:[%s493_s3 + $0x10] sm:$0xff] }
   0xb   :  { %262 = vmatprep.subr.mxu0 %v326_v0  ;;  %295 = vmatprep.subr.mxu1 %v326_v0  ;;  %v129_v29 = vld [vmem:[%s493_s3 + $0x20] sm:$0xff]  ;;  %v126_v32 = vld [vmem:[%s493_s3 + $0x8] sm:$0xff] }
   0xc   :  { %263 = vmatpush3.msra.mxu0 %v34_v9  ;;  %296 = vmatpush3.msra.mxu1 %v136_v12  ;;  %v125_v33 = vld [vmem:[%s493_s3] sm:$0xff] }
   0xd   :  { %264 = vmatprep.subr.mxu0 %v326_v0  ;;  %297 = vmatprep.subr.mxu1 %v326_v0  ;;  %v217_v34 = vld [vmem:[%s495_s2] ss:$0 sm:$0xff] }
   0xe   :  { %265 = vmatpush3.msra.mxu0 %v33_v11  ;;  %298 = vmatpush3.msra.mxu1 %v135_v14 }
   0xf   :  { %266 = vmatprep.subr.mxu0 %v326_v0  ;;  %299 = vmatprep.subr.mxu1 %v326_v0 }
  0x10   :  { %267 = vmatpush3.msra.mxu0 %v32_v13  ;;  %300 = vmatpush3.msra.mxu1 %v134_v16 }
  0x11   :  { %268 = vmatprep.subr.mxu0 %v326_v0  ;;  %301 = vmatprep.subr.mxu1 %v326_v0 }
  0x12   :  { %269 = vmatpush3.msra.mxu0 %v31_v15  ;;  %302 = vmatpush3.msra.mxu1 %v133_v25 }
  0x13   :  { %270 = vmatprep.subr.mxu0 %v326_v0  ;;  %303 = vmatprep.subr.mxu1 %v326_v0 }
  0x14   :  { %271 = vmatpush3.msra.mxu0 %v30_v17  ;;  %304 = vmatpush3.msra.mxu1 %v132_v26 }
  0x15   :  { %272 = vmatprep.subr.mxu0 %v326_v0  ;;  %305 = vmatprep.subr.mxu1 %v326_v0 }
  0x16   :  { %273 = vmatpush3.msra.mxu0 %v29_v18  ;;  %306 = vmatpush3.msra.mxu1 %v131_v27 }
  0x17   :  { %274 = vmatprep.subr.mxu0 %v326_v0  ;;  %307 = vmatprep.subr.mxu1 %v326_v0 }
  0x18   :  { %275 = vmatpush3.msra.mxu0 %v28_v19  ;;  %308 = vmatpush3.msra.mxu1 %v130_v28 }
  0x19   :  { %276 = vmatprep.subr.mxu0 %v326_v0  ;;  %309 = vmatprep.subr.mxu1 %v326_v0 }
  0x1a   :  { %277 = vmatpush3.msra.mxu0 %v27_v20  ;;  %310 = vmatpush3.msra.mxu1 %v129_v29 }
  0x1b   :  { %278 = vmatprep.subr.mxu0 %v326_v0  ;;  %311 = vmatprep.subr.mxu1 %v326_v0 }
  0x1c   :  { %279 = vmatpush3.msra.mxu0 %v26_v21  ;;  %312 = vmatpush3.msra.mxu1 %v128_v30 }
  0x1d   :  { %280 = vmatprep.subr.mxu0 %v326_v0  ;;  %313 = vmatprep.subr.mxu1 %v326_v0 }
  0x1e   :  { %281 = vmatpush3.msra.mxu0 %v25_v22  ;;  %314 = vmatpush3.msra.mxu1 %v127_v31 }
  0x1f   :  { %282 = vmatprep.subr.mxu0 %v326_v0  ;;  %315 = vmatprep.subr.mxu1 %v326_v0 }
  0x20   :  { %283 = vmatpush3.msra.mxu0 %v24_v23  ;;  %316 = vmatpush3.msra.mxu1 %v126_v32 }
  0x21   :  { %285 = vmatmul.mubr.f32.vlgmr.msra.gmra.mxu0 %v23_v24  ;;  %317 = vmatprep.subr.mxu1 %v326_v0 }
  0x22   :  { %318 = vmatpush3.msra.mxu1 %v125_v33 }
  0xe1   :  { %v106_v35 = vpop.f32.mrf.mxu0 }
  0xe2   :  { %v123_v36 = vadd.f32 %v217_v34, %v106_v35 }
  0xe3   :  { %v286_v37 = vpop.f32.mrf.mxu0 }
  0xe4   :  { %324 = vtanh.f32 %v123_v36 }
  0xf1   :  { %v325_v38 = vpop.eup %324 }
  0xf2   :  { %320 = vmatmul.mubr.f32.vlgmr.msra.gmra.mxu1 %v325_v38 }
 0x1b2   :  { %v207_v39 = vpop.f32.mrf.mxu1 }
 0x1b3   :  { %212 = vst.msk [vmem:[%s496_s4] sm:$0xff] %vm211_vm1, %v207_v39 }
 0x1b4   :  { %v321_v40 = vpop.f32.mrf.mxu1 }

</bundles_post_ra>
